<compile_context>
chip_gen: v6e
topology: v6e:2x2x1
jax: 0.10.0
libtpu: 0.0.40
codegen_flags: <defaults>
</compile_context>

<pallas_src>
import numpy as np
import jax
import jax.numpy as jnp
from jax import lax
from jax.experimental import pallas as pl
from jax.experimental.pallas import tpu as pltpu


def get_gaussian_filter(filter_size: int, sigma: float) -> np.ndarray:
    """Dense 2-D Gaussian filter, exactly as in the PyTorch module (float64)."""
    assert filter_size % 2 == 1
    G = np.zeros((filter_size, filter_size))
    c = filter_size // 2
    for i in range(c + 1):
        for j in range(c + 1):
            r = i * i + j * j
            G[c + i, c + j] = r
            G[c + i, c - j] = r
            G[c - i, c + j] = r
            G[c - i, c - j] = r
    G = np.exp(-G / sigma) / (np.pi * sigma)
    G = G / G.sum()
    return G


def get_gaussian_taps_1d(filter_size: int, sigma: float) -> np.ndarray:
    """1-D separable factor: outer(t, t) == get_gaussian_filter(...) exactly."""
    c = filter_size // 2
    u = np.exp(-np.arange(-c, c + 1, dtype=np.float64) ** 2 / sigma)
    return u / u.sum()


def _make_filter_kernel(size: int, taps_1d, c_blk: int, H: int, W: int, strip: int):
    """Kernel body for an UNPADDED (1, c_blk, H, W) -> (1, c_blk, H, W) block.

    Zero padding is handled in-register per row-strip; W-pass and H-pass are
    fused per strip so no full-size intermediate is materialized. Taps are
    trace-time Python float constants.
    """
    c = size // 2
    taps = [float(t) for t in taps_1d]  # baked constants, no SMEM traffic

    def kernel(x_ref, o_ref):
        # Static Python loop over row strips (bounded unroll; offsets static).
        for y0 in range(0, H, strip):
            rows = min(strip, H - y0)
            # Input rows needed for this output strip: [y0 - c, y0 + rows + c)
            lo, hi = y0 - c, y0 + rows + c
            lo_c, hi_c = max(lo, 0), min(hi, H)

            # Load only the valid rows of the strip and cast once (small slab).
            xs = x_ref[0, :, lo_c:hi_c, :].astype(jnp.float32)  # (c_blk, valid, W)

            # Zero halo rows (top/bottom of the image) — in-register, not HBM.
            top, bot = lo_c - lo, hi - hi_c
            parts = []
            if top:
                parts.append(jnp.zeros((c_blk, top, W), jnp.float32))
            parts.append(xs)
            if bot:
                parts.append(jnp.zeros((c_blk, bot, W), jnp.float32))
            if len(parts) > 1:
                xs = jnp.concatenate(parts, axis=1)             # (c_blk, rows+2c, W)

            # Zero halo columns (left/right of the image).
            if c > 0:
                zc = jnp.zeros((c_blk, rows + 2 * c, c), jnp.float32)
                xs = jnp.concatenate([zc, xs, zc], axis=2)      # (c_blk, rows+2c, W+2c)

            # --- separable W pass (lane axis): `size` shifted slices ---
            tmp = taps[0] * xs[:, :, 0:W]
            for j in range(1, size):
                tmp = tmp + taps[j] * xs[:, :, j:j + W]         # (c_blk, rows+2c, W)

            # --- separable H pass (sublane axis), fused with the strip ---
            acc = taps[0] * tmp[:, 0:rows, :]
            for i in range(1, size):
                acc = acc + taps[i] * tmp[:, i:i + rows, :]     # (c_blk, rows, W)

            # Sublane-aligned strip store (y0 multiple of `strip`).
            o_ref[0, :, y0:y0 + rows, :] = acc.astype(o_ref.dtype)

    return kernel


def _pick_strip(h: int) -> int:
    """Row-strip height: 8 sublanes (or all of H if tiny); grow for huge H to
    bound the static unroll count."""
    if h <= 8:
        return h
    strip = 8
    while -(-h // strip) > 16:  # keep <= ~16 unrolled strips
        strip *= 2
    return min(strip, h)


def _pick_channel_block(batch: int, channels: int, h: int, w: int,
                        itemsize: int, size: int, strip: int) -> int:
    """Largest divisor of `channels` such that:
       * total grid steps >= min(8, batch*channels)  (pipelining / megacore),
       * input tile <= ~1 MiB,
       * double-buffered in+out + per-strip intermediates <= 8 MiB
         (conservative: fits default scoped VMEM on v5e/v6e/v7x)."""
    c = size // 2
    budget = 8 * 1024 * 1024
    target_tile = 1 * 1024 * 1024
    want_steps = min(8, batch * channels)
    best = 1
    for cb in range(1, channels + 1):
        if channels % cb:
            continue
        steps = batch * (channels // cb)
        tile = cb * h * w * itemsize
        rows_p = min(strip, h) + 2 * c
        interm = 3 * cb * rows_p * (w + 2 * c) * 4        # xs + tmp + acc (f32)
        total = 2 * 2 * tile + interm                     # double-buffered in + out
        if steps >= want_steps and tile <= target_tile and total <= budget:
            best = cb
    return best


class FilterPallas:
    """JAX/Pallas equivalent of the PyTorch `Filter` module."""

    def __init__(self, size: int, sigma: float, channels: int):
        self.size = size
        self.c = size // 2
        self.sigma = sigma
        self.channels = channels
        g2d = get_gaussian_filter(size, sigma)
        # Same parameter layout as PyTorch: (channels, 1, size, size).
        self.G = jnp.asarray(
            np.repeat(g2d[np.newaxis, np.newaxis, :], channels, 0).astype(np.float32))
        # Separable 1-D taps (float64; baked as constants into the kernel).
        self._taps = get_gaussian_taps_1d(size, sigma)

    def __call__(self, x):
        return self.forward(x)

    def forward(self, x):
        shape = x.shape
        squeeze = False
        if len(shape) == 4:
            b, ch, h, w = shape
        elif len(shape) == 3:
            ch, h, w = shape
            b = 1
            x = x[None]
            squeeze = True
        else:
            raise AssertionError("expected 3D or 4D input")
        assert ch == self.channels

        strip = _pick_strip(h)
        itemsize = int(jnp.dtype(x.dtype).itemsize)
        c_blk = _pick_channel_block(b, ch, h, w, itemsize, self.size, strip)
        kernel = _make_filter_kernel(self.size, self._taps, c_blk, h, w, strip)

        out = pl.pallas_call(
            kernel,
            out_shape=jax.ShapeDtypeStruct((b, ch, h, w), x.dtype),
            grid=(b, ch // c_blk),
            in_specs=[
                # Unpadded block; last two dims equal the full array dims,
                # satisfying the (8,128) tiling rule. Halo handled in-kernel.
                pl.BlockSpec((1, c_blk, h, w), lambda bi, ci: (bi, ci, 0, 0)),
            ],
            out_specs=pl.BlockSpec((1, c_blk, h, w), lambda bi, ci: (bi, ci, 0, 0)),
            compiler_params=pltpu.CompilerParams(
                dimension_semantics=("parallel", "parallel")),
        )(x)

        if squeeze:
            out = out[0]
        return out


def _reference(x, G, channels, pad):
    """Pure-JAX reference: depthwise conv2d, NCHW, highest precision."""
    return lax.conv_general_dilated(
        x, G,
        window_strides=(1, 1),
        padding=[(pad, pad), (pad, pad)],
        dimension_numbers=("NCHW", "OIHW", "NCHW"),
        feature_group_count=channels,
        precision=lax.Precision.HIGHEST,
    )


if __name__ == "__main__":
    key = jax.random.PRNGKey(0)
    B, C, H, W = 2, 4, 16, 16
    size, sigma = 5, 1.0

    x = jax.random.normal(key, (B, C, H, W), dtype=jnp.float32)

    filt = FilterPallas(size=size, sigma=sigma, channels=C)

    out = jax.block_until_ready(filt(x))

    ref = _reference(x, filt.G, C, filt.c)
    assert out.shape == (B, C, H, W)
    ok = np.allclose(np.asarray(out), np.asarray(ref), atol=1e-5, rtol=1e-5)
    assert ok, "Pallas output does not match reference depthwise conv"

    # Also exercise the 3D (C, H, W) path, like the PyTorch module supports.
    out3 = jax.block_until_ready(filt(x[0]))
    assert out3.shape == (C, H, W)
    ok3 = np.allclose(np.asarray(out3), np.asarray(ref[0]), atol=1e-5, rtol=1e-5)
    assert ok3, "3D path does not match reference"

    print("KERNEL_OK")
</pallas_src>

<mosaic_0001>
module attributes {stable_mosaic.version = 11 : i64} {
  func.func @kernel(%arg0: i32, %arg1: i32, %arg2: memref<1x1x16x16xf32, #tpu.memory_space<vmem>>, %arg3: memref<1x1x16x16xf32, #tpu.memory_space<vmem>>) attributes {dimension_semantics = [#tpu.dimension_semantics<parallel>, #tpu.dimension_semantics<parallel>], iteration_bounds = array<i64: 2, 4>, scalar_prefetch = 0 : i64, scratch_operands = 0 : i64, tpu.core_type = #tpu.core_type<tc>, window_params = [{transform_indices = @transform_0, window_bounds = array<i64: 1, 1, 16, 16>}, {transform_indices = @transform_1, window_bounds = array<i64: 1, 1, 16, 16>}]} {
    %c0 = arith.constant 0 : index
    %c0_0 = arith.constant 0 : index
    %c0_1 = arith.constant 0 : index
    %c0_2 = arith.constant 0 : index
    %0 = vector.load %arg2[%c0, %c0_0, %c0_1, %c0_2] : memref<1x1x16x16xf32, #tpu.memory_space<vmem>>, vector<1x1x10x16xf32>
    %1 = vector.shape_cast %0 : vector<1x1x10x16xf32> to vector<1x10x16xf32>
    %cst = arith.constant 0.000000e+00 : f32
    %2 = vector.broadcast %cst : f32 to vector<1x2x16xf32>
    %3 = tpu.concatenate %2, %1 in 1 : vector<1x2x16xf32>, vector<1x10x16xf32> -> vector<1x12x16xf32>
    %cst_3 = arith.constant 0.000000e+00 : f32
    %4 = vector.broadcast %cst_3 : f32 to vector<1x12x2xf32>
    %5 = tpu.concatenate %4, %3, %4 in 2 : vector<1x12x2xf32>, vector<1x12x16xf32>, vector<1x12x2xf32> -> vector<1x12x20xf32>
    %6 = vector.extract_strided_slice %5 {offsets = [0, 0, 0], sizes = [1, 12, 16], strides = [1, 1, 1]} : vector<1x12x20xf32> to vector<1x12x16xf32>
    %cst_4 = arith.constant 0.010333864 : f32
    %7 = vector.broadcast %cst_4 : f32 to vector<1x12x16xf32>
    %8 = arith.mulf %7, %6 : vector<1x12x16xf32>
    %9 = vector.extract_strided_slice %5 {offsets = [0, 0, 1], sizes = [1, 12, 16], strides = [1, 1, 1]} : vector<1x12x20xf32> to vector<1x12x16xf32>
    %cst_5 = arith.constant 0.20756121 : f32
    %10 = vector.broadcast %cst_5 : f32 to vector<1x12x16xf32>
    %11 = arith.mulf %10, %9 : vector<1x12x16xf32>
    %12 = arith.addf %8, %11 : vector<1x12x16xf32>
    %13 = vector.extract_strided_slice %5 {offsets = [0, 0, 2], sizes = [1, 12, 16], strides = [1, 1, 1]} : vector<1x12x20xf32> to vector<1x12x16xf32>
    %cst_6 = arith.constant 0.564209878 : f32
    %14 = vector.broadcast %cst_6 : f32 to vector<1x12x16xf32>
    %15 = arith.mulf %14, %13 : vector<1x12x16xf32>
    %16 = arith.addf %12, %15 : vector<1x12x16xf32>
    %17 = vector.extract_strided_slice %5 {offsets = [0, 0, 3], sizes = [1, 12, 16], strides = [1, 1, 1]} : vector<1x12x20xf32> to vector<1x12x16xf32>
    %cst_7 = arith.constant 0.20756121 : f32
    %18 = vector.broadcast %cst_7 : f32 to vector<1x12x16xf32>
    %19 = arith.mulf %18, %17 : vector<1x12x16xf32>
    %20 = arith.addf %16, %19 : vector<1x12x16xf32>
    %21 = vector.extract_strided_slice %5 {offsets = [0, 0, 4], sizes = [1, 12, 16], strides = [1, 1, 1]} : vector<1x12x20xf32> to vector<1x12x16xf32>
    %cst_8 = arith.constant 0.010333864 : f32
    %22 = vector.broadcast %cst_8 : f32 to vector<1x12x16xf32>
    %23 = arith.mulf %22, %21 : vector<1x12x16xf32>
    %24 = arith.addf %20, %23 : vector<1x12x16xf32>
    %25 = vector.extract_strided_slice %24 {offsets = [0, 0, 0], sizes = [1, 8, 16], strides = [1, 1, 1]} : vector<1x12x16xf32> to vector<1x8x16xf32>
    %cst_9 = arith.constant 0.010333864 : f32
    %26 = vector.broadcast %cst_9 : f32 to vector<1x8x16xf32>
    %27 = arith.mulf %26, %25 : vector<1x8x16xf32>
    %28 = vector.extract_strided_slice %24 {offsets = [0, 1, 0], sizes = [1, 8, 16], strides = [1, 1, 1]} : vector<1x12x16xf32> to vector<1x8x16xf32>
    %cst_10 = arith.constant 0.20756121 : f32
    %29 = vector.broadcast %cst_10 : f32 to vector<1x8x16xf32>
    %30 = arith.mulf %29, %28 : vector<1x8x16xf32>
    %31 = arith.addf %27, %30 : vector<1x8x16xf32>
    %32 = vector.extract_strided_slice %24 {offsets = [0, 2, 0], sizes = [1, 8, 16], strides = [1, 1, 1]} : vector<1x12x16xf32> to vector<1x8x16xf32>
    %cst_11 = arith.constant 0.564209878 : f32
    %33 = vector.broadcast %cst_11 : f32 to vector<1x8x16xf32>
    %34 = arith.mulf %33, %32 : vector<1x8x16xf32>
    %35 = arith.addf %31, %34 : vector<1x8x16xf32>
    %36 = vector.extract_strided_slice %24 {offsets = [0, 3, 0], sizes = [1, 8, 16], strides = [1, 1, 1]} : vector<1x12x16xf32> to vector<1x8x16xf32>
    %cst_12 = arith.constant 0.20756121 : f32
    %37 = vector.broadcast %cst_12 : f32 to vector<1x8x16xf32>
    %38 = arith.mulf %37, %36 : vector<1x8x16xf32>
    %39 = arith.addf %35, %38 : vector<1x8x16xf32>
    %40 = vector.extract_strided_slice %24 {offsets = [0, 4, 0], sizes = [1, 8, 16], strides = [1, 1, 1]} : vector<1x12x16xf32> to vector<1x8x16xf32>
    %cst_13 = arith.constant 0.010333864 : f32
    %41 = vector.broadcast %cst_13 : f32 to vector<1x8x16xf32>
    %42 = arith.mulf %41, %40 : vector<1x8x16xf32>
    %43 = arith.addf %39, %42 : vector<1x8x16xf32>
    %c0_14 = arith.constant 0 : index
    %c0_15 = arith.constant 0 : index
    %c0_16 = arith.constant 0 : index
    %c0_17 = arith.constant 0 : index
    %44 = vector.load %arg3[%c0_14, %c0_15, %c0_16, %c0_17] : memref<1x1x16x16xf32, #tpu.memory_space<vmem>>, vector<1x1x8x16xf32>
    %45 = vector.shape_cast %44 : vector<1x1x8x16xf32> to vector<1x8x16xf32>
    %46 = vector.shape_cast %43 : vector<1x8x16xf32> to vector<1x1x8x16xf32>
    tpu.vector_store %arg3[%c0_14, %c0_15, %c0_16, %c0_17], %46 {strides = array<i32>} : memref<1x1x16x16xf32, #tpu.memory_space<vmem>>, vector<1x1x8x16xf32>,
    %c0_18 = arith.constant 0 : index
    %c0_19 = arith.constant 0 : index
    %c6 = arith.constant 6 : index
    %c0_20 = arith.constant 0 : index
    %47 = vector.load %arg2[%c0_18, %c0_19, %c6, %c0_20] : memref<1x1x16x16xf32, #tpu.memory_space<vmem>>, vector<1x1x10x16xf32>
    %48 = vector.shape_cast %47 : vector<1x1x10x16xf32> to vector<1x10x16xf32>
    %cst_21 = arith.constant 0.000000e+00 : f32
    %49 = vector.broadcast %cst_21 : f32 to vector<1x2x16xf32>
    %50 = tpu.concatenate %48, %49 in 1 : vector<1x10x16xf32>, vector<1x2x16xf32> -> vector<1x12x16xf32>
    %cst_22 = arith.constant 0.000000e+00 : f32
    %51 = vector.broadcast %cst_22 : f32 to vector<1x12x2xf32>
    %52 = tpu.concatenate %51, %50, %51 in 2 : vector<1x12x2xf32>, vector<1x12x16xf32>, vector<1x12x2xf32> -> vector<1x12x20xf32>
    %53 = vector.extract_strided_slice %52 {offsets = [0, 0, 0], sizes = [1, 12, 16], strides = [1, 1, 1]} : vector<1x12x20xf32> to vector<1x12x16xf32>
    %cst_23 = arith.constant 0.010333864 : f32
    %54 = vector.broadcast %cst_23 : f32 to vector<1x12x16xf32>
    %55 = arith.mulf %54, %53 : vector<1x12x16xf32>
    %56 = vector.extract_strided_slice %52 {offsets = [0, 0, 1], sizes = [1, 12, 16], strides = [1, 1, 1]} : vector<1x12x20xf32> to vector<1x12x16xf32>
    %cst_24 = arith.constant 0.20756121 : f32
    %57 = vector.broadcast %cst_24 : f32 to vector<1x12x16xf32>
    %58 = arith.mulf %57, %56 : vector<1x12x16xf32>
    %59 = arith.addf %55, %58 : vector<1x12x16xf32>
    %60 = vector.extract_strided_slice %52 {offsets = [0, 0, 2], sizes = [1, 12, 16], strides = [1, 1, 1]} : vector<1x12x20xf32> to vector<1x12x16xf32>
    %cst_25 = arith.constant 0.564209878 : f32
    %61 = vector.broadcast %cst_25 : f32 to vector<1x12x16xf32>
    %62 = arith.mulf %61, %60 : vector<1x12x16xf32>
    %63 = arith.addf %59, %62 : vector<1x12x16xf32>
    %64 = vector.extract_strided_slice %52 {offsets = [0, 0, 3], sizes = [1, 12, 16], strides = [1, 1, 1]} : vector<1x12x20xf32> to vector<1x12x16xf32>
    %cst_26 = arith.constant 0.20756121 : f32
    %65 = vector.broadcast %cst_26 : f32 to vector<1x12x16xf32>
    %66 = arith.mulf %65, %64 : vector<1x12x16xf32>
    %67 = arith.addf %63, %66 : vector<1x12x16xf32>
    %68 = vector.extract_strided_slice %52 {offsets = [0, 0, 4], sizes = [1, 12, 16], strides = [1, 1, 1]} : vector<1x12x20xf32> to vector<1x12x16xf32>
    %cst_27 = arith.constant 0.010333864 : f32
    %69 = vector.broadcast %cst_27 : f32 to vector<1x12x16xf32>
    %70 = arith.mulf %69, %68 : vector<1x12x16xf32>
    %71 = arith.addf %67, %70 : vector<1x12x16xf32>
    %72 = vector.extract_strided_slice %71 {offsets = [0, 0, 0], sizes = [1, 8, 16], strides = [1, 1, 1]} : vector<1x12x16xf32> to vector<1x8x16xf32>
    %cst_28 = arith.constant 0.010333864 : f32
    %73 = vector.broadcast %cst_28 : f32 to vector<1x8x16xf32>
    %74 = arith.mulf %73, %72 : vector<1x8x16xf32>
    %75 = vector.extract_strided_slice %71 {offsets = [0, 1, 0], sizes = [1, 8, 16], strides = [1, 1, 1]} : vector<1x12x16xf32> to vector<1x8x16xf32>
    %cst_29 = arith.constant 0.20756121 : f32
    %76 = vector.broadcast %cst_29 : f32 to vector<1x8x16xf32>
    %77 = arith.mulf %76, %75 : vector<1x8x16xf32>
    %78 = arith.addf %74, %77 : vector<1x8x16xf32>
    %79 = vector.extract_strided_slice %71 {offsets = [0, 2, 0], sizes = [1, 8, 16], strides = [1, 1, 1]} : vector<1x12x16xf32> to vector<1x8x16xf32>
    %cst_30 = arith.constant 0.564209878 : f32
    %80 = vector.broadcast %cst_30 : f32 to vector<1x8x16xf32>
    %81 = arith.mulf %80, %79 : vector<1x8x16xf32>
    %82 = arith.addf %78, %81 : vector<1x8x16xf32>
    %83 = vector.extract_strided_slice %71 {offsets = [0, 3, 0], sizes = [1, 8, 16], strides = [1, 1, 1]} : vector<1x12x16xf32> to vector<1x8x16xf32>
    %cst_31 = arith.constant 0.20756121 : f32
    %84 = vector.broadcast %cst_31 : f32 to vector<1x8x16xf32>
    %85 = arith.mulf %84, %83 : vector<1x8x16xf32>
    %86 = arith.addf %82, %85 : vector<1x8x16xf32>
    %87 = vector.extract_strided_slice %71 {offsets = [0, 4, 0], sizes = [1, 8, 16], strides = [1, 1, 1]} : vector<1x12x16xf32> to vector<1x8x16xf32>
    %cst_32 = arith.constant 0.010333864 : f32
    %88 = vector.broadcast %cst_32 : f32 to vector<1x8x16xf32>
    %89 = arith.mulf %88, %87 : vector<1x8x16xf32>
    %90 = arith.addf %86, %89 : vector<1x8x16xf32>
    %c0_33 = arith.constant 0 : index
    %c0_34 = arith.constant 0 : index
    %c8 = arith.constant 8 : index
    %c0_35 = arith.constant 0 : index
    %91 = vector.load %arg3[%c0_33, %c0_34, %c8, %c0_35] : memref<1x1x16x16xf32, #tpu.memory_space<vmem>>, vector<1x1x8x16xf32>
    %92 = vector.shape_cast %91 : vector<1x1x8x16xf32> to vector<1x8x16xf32>
    %93 = vector.shape_cast %90 : vector<1x8x16xf32> to vector<1x1x8x16xf32>
    tpu.vector_store %arg3[%c0_33, %c0_34, %c8, %c0_35], %93 {strides = array<i32>} : memref<1x1x16x16xf32, #tpu.memory_space<vmem>>, vector<1x1x8x16xf32>,
    return
  }
  func.func @transform_0(%arg0: i32, %arg1: i32) -> (i32, i32, i32, i32) {
    %c0_i32 = arith.constant 0 : i32
    %c0_i32_0 = arith.constant 0 : i32
    %c0_i32_1 = arith.constant 0 : i32
    return %arg0, %arg1, %c0_i32, %c0_i32_0 : i32, i32, i32, i32
  }
  func.func @transform_1(%arg0: i32, %arg1: i32) -> (i32, i32, i32, i32) {
    %c0_i32 = arith.constant 0 : i32
    %c0_i32_0 = arith.constant 0 : i32
    %c0_i32_1 = arith.constant 0 : i32
    return %arg0, %arg1, %c0_i32, %c0_i32_0 : i32, i32, i32, i32
  }
}

</mosaic_0001>

<bundles_post_ra>
// kernel: tpu_custom_call.1
= control target key start
LH: loop header
LB: loop body
LE: loop exit
PB: predicated region body
PF: predicated region fallthrough
CT: control target
= control target key end

     0   :  { %6 = vsyncpa [#allocation3], 0  ;;  %s895_s0 = inlined_call_operand.hbm [shape: f32[2,4,16,16], index: 0, kind: input, shape index: {}]   ;;  %s896_s1 = inlined_call_operand.hbm [shape: f32[2,4,16,16], index: 1, kind: output, shape index: {}]  }
   0x1   :  { %8 = vsyncpa [#allocation3 + $0x1], 0 }
   0x2   :  { %9 = vsyncpa [#allocation4], 0 }
   0x3   :  { %11 = vsyncpa [#allocation4 + $0x1], 0  ;;  %s707_s6 = smov 0   ;;  %s709_s7 = smov 0  }
   0x4   :  { %s711_s8 = smov 0   ;;  %s713_s9 = smov 0  }
   0x5   :  { %s715_s10 = smov 0   ;;  %s717_s11 = smov 0  }
   0x6   :  { %s719_s12 = smov 0   ;;  %s721_s13 = smov 0  }
   0x7 LB: > { %s456_s14 = sadd.s32 4294967295, %s684_s13   ;;  %s457_s15 = sadd.s32 4294967294, %s684_s13   ;;  %s684_s13 = sphi %s721_s13, %s17_s13   ;;  %s680_s12 = sphi %s719_s12, %s908_s12   ;;  %s676_s11 = sphi %s717_s11, %s907_s11   ;;  %s672_s10 = sphi %s715_s10, %s906_s10   ;;  %s668_s9 = sphi %s713_s9, %s905_s9   ;;  %s664_s8 = sphi %s711_s8, %s904_s8   ;;  %s660_s7 = sphi %s709_s7, %s903_s7   ;;  %s656_s6 = sphi %s707_s6, %s902_s6  }
   0x8   : > { %s26_s16 = sadd.s32 1, %s676_s11  ;;  %s29_s17 = sadd.s32 1, %s680_s12 }
   0x9   : > { %p27_p0 = scmp.ge.s32.totalorder %s26_s16, 4  ;;  %s38_s18 = sadd.s32 1, %s664_s8 }
   0xa   : > { %p45_p1 = scmp.ne.s32.totalorder %s664_s8, %s660_s7  ;;  %p46_p2 = scmp.eq.s32.totalorder %s684_s13, 0 }
   0xb   : > { %s910_s16 = smov (%p27_p0, %s26_s16), 0  ;;  %s912_s17 = smov (!%p27_p0, %s29_s17), %s680_s12 }
   0xc   : > { %s34_s19 = ssub.s32 %s676_s11, %s910_s16  ;;  %p760_p3 = por %p46_p2, %p45_p1 }
   0xd   : > { %p31_p4 = scmp.ge.s32.totalorder %s912_s17, 2  ;;  %p51_p5 = scmp.ne.s32.totalorder %s660_s7, %s656_s6 }
   0xe   : > { %p52_p6 = scmp.eq.s32.totalorder %s456_s14, 0  ;;  %p77_p7 = scmp.eq.s32.totalorder %s456_s14, 7 }
   0xf   : > { %s914_s17 = smov (%p31_p4, %s912_s17), 0  ;;  %p83_p10 = scmp.eq.s32.totalorder %s457_s15, 7 }
  0x10   : > { %p768_p8 = por %p52_p6, %p51_p5  ;;  %p772_p9 = por %p77_p7, %p45_p1 }
  0x11   : > { %s33_s23 = ssub.s32 %s680_s12, %s914_s17  ;;  %p778_p12 = por %p83_p10, %p51_p5 }
  0x12   : > { %s35_s24 = sor.u32 %s34_s19, %s33_s23  ;;  %p485_p13 = scmp.lt.s32.totalorder %s684_s13, 8 }
  0x13   : > { %p36_p11 = scmp.eq.s32.totalorder %s35_s24, 0  ;;  %s103_s26 = sand.u32 1, %s664_s8  }
  0x14   : > { %s460_s28 = sshll.u32 %s103_s26, 4  ;;  %s461_s29 = sshll.u32 %s676_s11, 1 }
  0x15   : > { %s785_s27 = scalar_select %p36_p11, %s664_s8, %s38_s18  }
  0x16   : > { %s462_s30 = sshll.u32 %s680_s12, 3  ;;  %s107_s2 = scalar_lea.vmem [#allocation2], %s460_s28 }
  0x17   : > { %s116_s3 = sshll.u32 %s107_s2, 4  ;;  %s113_s4 = sadd.s32 %s462_s30, %s461_s29  ;;  %s117_s3 = int_to_ptr.vmem [resolvable:$true] %s116_s3 }
  0x18   : > { %s463_s5 = sshll.u32 %s113_s4, 7  ;;  %p791_p0 = pnand %p485_p13, %p760_p3 }
  0x19   : > { %s115_s23 = scalar_lea.hbm %s895_s0, %s463_s5  ;;  %s104_s18 = scalar_lea.sflag [#allocation3], %s103_s26 }
  0x1a   : > { %p562_p1 = pneg %p791_p0  ;;  %s573_s24 = scalar_lea.vmem %s117_s3, 256 }
  0x1b   : > { %p574_p2 = scmp.ne.s32.totalorder %s117_s3, %s573_s24  ;;  %s686_s28 = smov [#allocation2]  }
  0x1c   : > { %s578_s29 = sshll.u32 %s686_s28, 4  ;;  %s579_s29 = int_to_ptr.vmem [resolvable:$false] %s578_s29 }
  0x1d   : > { %p576_p4 = pnand %p574_p2, %p562_p1  ;;  %s580_s20 = scalar_lea.vmem %s579_s29, 512 }
  0x1e   : > { %p581_p3 = scmp.lt.s32.totalorder %s117_s3, %s579_s29  ;;  %p582_p6 = scmp.lt.s32.totalorder %s580_s20, %s573_s24 }
  0x1f   : > { %p577_p5 = pneg %p576_p4 }
  0x20   : > { %p583_p7 = por %p582_p6, %p581_p3 }
  0x22   : > { %p584_p10 = pnand %p583_p7, %p577_p5 }
  0x24   : > { %587 = shalt.err (!%p584_p10)
}
  0x25   : > { %s687_s30 = smov 128   ;;  %s688_s26 = smov 8  }
  0x26   : > { %480 = dma.hbm_to_vmem [thread:$0]  (!%p791_p0), %s115_s23, 256, %s117_s3, %s104_s18, %s687_s30, %s687_s30, %s688_s26  }
  0x27   : > { %p464_p11 = scmp.ge.s32.totalorder %s684_s13, 1  ;;  %p124_p13 = scmp.lt.s32.totalorder %s684_s13, 9 }
  0x29   : > { %p125_p1 = pnand %p464_p11, %p124_p13 }
  0x2a   : > { %s805_s2 = sand.u32 (!%p125_p1), 1, %s660_s7  }
  0x2b   : > { %128 = sbr.rel (%p125_p1) target bundleno = 345 (0x159), region = 24  ;;  %s465_s4 = sshll.u32 (!%p125_p1), %s805_s2, 4 }
  0x2c   : > { %s131_s5 = scalar_lea.sflag (!%p125_p1), [#allocation3], %s805_s2  ;;  %s134_s15 = scalar_lea.vmem (!%p125_p1), [#allocation2], %s465_s4 }
  0x30   : > { %647 = dma.done.wait (%p768_p8), %s131_s5, 256  }
  0x31   : > { %649 = vsyncadd (%p768_p8), %s131_s5, 4294967040  ;;  %vm157_vm0 = vcmask 1041408   ;;  %v258_v0 = vld [vmem:[%s134_s15 + $0x6] sm:$0xff]  ;;  %v259_v1 = vld [vmem:[%s134_s15 + $0xe] sm:$0x3]  ;;  %s689_s3 = smov 2  }
  0x32   : > { %v153_v2 = vld [vmem:[%s134_s15] sm:$0xff]  ;;  %263 = vrot.lane.b32.xlu1 %v258_v0, %s689_s3  ;;  %v154_v4 = vld [vmem:[%s134_s15 + $0x8] sm:$0x3]  ;;  %v260_v5 = vsel %vm157_vm0, %v259_v1, 0.0  ;;  %vm170_vm1 = vcmask 15360   ;;  %vm173_vm2 = vcmask 146432  }
  0x33   : > { %v158_v3 = vrot.slane %v153_v2, 6  ;;  %v159_v6 = vrot.slane %v154_v4, 6  ;;  %s690_s21 = smov 127   ;;  %s691_s14 = smov 126   ;;  %vm225_vm3 = vcmask 1046528   ;;  %vm235_vm4 = vcmask 1045504  }
  0x34   : > { %s692_s19 = smov 125   ;;  %s693_s23 = smov 124   ;;  %vm241_vm5 = vcmask 1044480   ;;  %vm250_vm6 = vcmask 1043456   ;;  %vm256_vm7 = vcmask 130048  }
  0x35   : > { %v162_v7 = vsel %vm157_vm0, 0.0, %v158_v3  ;;  %v160_v8 = vsel %vm157_vm0, %v158_v3, %v159_v6  ;;  %s468_s18 = sshll.u32 %s668_s9, 1  ;;  %s469_s24 = sshll.u32 %s672_s10, 3 }
  0x36   : > { %164 = vrot.lane.b32.xlu0 %v162_v7, %s689_s3  ;;  %265 = vrot.lane.b32.xlu1 %v260_v5, %s689_s3  ;;  %s363_s28 = sadd.s32 %s469_s24, %s468_s18  ;;  %s152_s10 = scalar_lea.vmem [#allocation5], %s465_s4 }
  0x37   : > { %s470_s9 = sshll.u32 %s363_s28, 7  ;;  %s366_s29 = sshll.u32 %s152_s10, 4  ;;  %s841_s29 = int_to_ptr.vmem [resolvable:$true] %s366_s29 }
  0x38   : > { %s839_s26 = scalar_lea.hbm %s896_s1, %s470_s9  ;;  %s351_s4 = scalar_lea.sflag [#allocation4], %s805_s2 }
  0x39   : > { %s588_s5 = scalar_lea.vmem %s841_s29, 256  ;;  %s694_s15 = smov [#allocation5]  }
  0x3a   : > { %166 = vrot.lane.b32.xlu0 %v160_v8, %s689_s3  ;;  %p589_p8 = scmp.ne.s32.totalorder %s841_s29, %s588_s5  ;;  %s592_s3 = sshll.u32 %s694_s15, 4  ;;  %s593_s3 = int_to_ptr.vmem [resolvable:$false] %s592_s3 }
  0x3b   : > { %p595_p4 = scmp.lt.s32.totalorder %s841_s29, %s593_s3 }
  0x3c   : > { %p590_p0 = pnand %p589_p8, %p772_p9 }
  0x3e   : > { %p591_p2 = pneg %p590_p0 }
  0xa4   : > { %v264_v9 = vpop.permute.xlu1 %263 }
  0xa5   : > { %v269_v10 = vsel %vm170_vm1, 0.0, %v264_v9 }
  0xa6   : > { %v271_v11 = vsel %vm173_vm2, %v269_v10, 0.0 }
  0xa7   : > { %v275_v12 = vmul.f32 0.20756121, %v271_v11  ;;  %v287_v17 = vmul.f32 0.5642099, %v271_v11  ;;  %v273_v30 = vmul.f32 0.010333864, %v271_v11 }
  0xa8   : > { %v165_v13 = vpop.permute.xlu0 %164  ;;  %v266_v14 = vpop.permute.xlu1 %265 }
  0xa9   : > { %v270_v15 = vsel %vm170_vm1, 0.0, %v266_v14  ;;  %279 = vrot.lane.b32.xlu0 %v275_v12, %s690_s21  ;;  %v171_v19 = vsel %vm170_vm1, 0.0, %v165_v13 }
  0xaa   : > { %v272_v16 = vsel %vm173_vm2, %v270_v15, 0.0  ;;  %v174_v21 = vsel %vm173_vm2, %v171_v19, 0.0 }
  0xab   : > { %v276_v18 = vmul.f32 0.20756121, %v272_v16  ;;  %v288_v22 = vmul.f32 0.5642099, %v272_v16  ;;  %v178_v24 = vmul.f32 0.20756121, %v174_v21 }
  0xac   : > { %v167_v20 = vpop.permute.xlu0 %166  ;;  %v190_v27 = vmul.f32 0.5642099, %v174_v21  ;;  %v176_v29 = vmul.f32 0.010333864, %v174_v21  ;;  %v274_v32 = vmul.f32 0.010333864, %v272_v16 }
  0xad   : > { %281 = vrot.lane.b32.xlu1 %v276_v18, %s690_s21  ;;  %291 = vrot.lane.b32.xlu0 %v287_v17, %s691_s14  ;;  %v172_v23 = vsel %vm170_vm1, 0.0, %v167_v20 }
  0xae   : > { %v175_v25 = vsel %vm173_vm2, %v172_v23, 0.0 }
  0xaf   : > { %v179_v26 = vmul.f32 0.20756121, %v175_v25  ;;  %v191_v28 = vmul.f32 0.5642099, %v175_v25  ;;  %v177_v31 = vmul.f32 0.010333864, %v175_v25 }
  0xb1   : > { %293 = vrot.lane.b32.xlu1 %v288_v22, %s691_s14  ;;  %299 = vrot.lane.b32.xlu0 %v275_v12, %s692_s19 }
  0xb5   : > { %301 = vrot.lane.b32.xlu1 %v276_v18, %s692_s19  ;;  %182 = vrot.lane.b32.xlu0 %v178_v24, %s690_s21 }
  0xb9   : > { %194 = vrot.lane.b32.xlu0 %v190_v27, %s691_s14  ;;  %184 = vrot.lane.b32.xlu1 %v179_v26, %s690_s21  ;;  %s594_s21 = scalar_lea.vmem %s593_s3, 512 }
  0xba   : > { %p596_p5 = scmp.lt.s32.totalorder %s594_s21, %s588_s5 }
  0xbc   : > { %p597_p3 = por %p596_p5, %p595_p4 }
  0xbd   : > { %202 = vrot.lane.b32.xlu0 %v178_v24, %s692_s19  ;;  %196 = vrot.lane.b32.xlu1 %v191_v28, %s691_s14 }
  0xbe   : > { %p598_p6 = pnand %p597_p3, %p591_p2 }
  0xc1   : > { %212 = vrot.lane.b32.xlu0 %v176_v29, %s693_s23  ;;  %204 = vrot.lane.b32.xlu1 %v179_v26, %s692_s19 }
  0xc5   : > { %309 = vrot.lane.b32.xlu0 %v273_v30, %s693_s23  ;;  %214 = vrot.lane.b32.xlu1 %v177_v31, %s693_s23 }
  0xc9   : > { %311 = vrot.lane.b32.xlu1 %v274_v32, %s693_s23 }
 0x11b   : > { %v280_v33 = vpop.permute.xlu0 %279 }
 0x11c   : > { %v285_v47 = vadd.f32 %v280_v33, %v273_v30 }
 0x11f   : > { %v282_v34 = vpop.permute.xlu1 %281  ;;  %v292_v35 = vpop.permute.xlu0 %291 }
 0x120   : > { %v297_v52 = vadd.f32 %v292_v35, %v285_v47  ;;  %v286_v54 = vadd.f32 %v282_v34, %v274_v32 }
 0x123   : > { %v294_v36 = vpop.permute.xlu1 %293  ;;  %v300_v37 = vpop.permute.xlu0 %299 }
 0x124   : > { %v305_v55 = vadd.f32 %v300_v37, %v297_v52  ;;  %v298_v59 = vadd.f32 %v294_v36, %v286_v54 }
 0x127   : > { %v302_v38 = vpop.permute.xlu1 %301  ;;  %v183_v39 = vpop.permute.xlu0 %182 }
 0x128   : > { %v188_v42 = vadd.f32 %v183_v39, %v176_v29  ;;  %v306_v63 = vadd.f32 %v302_v38, %v298_v59 }
 0x12b   : > { %v185_v40 = vpop.permute.xlu1 %184  ;;  %v195_v41 = vpop.permute.xlu0 %194 }
 0x12c   : > { %v200_v45 = vadd.f32 %v195_v41, %v188_v42  ;;  %v189_v48 = vadd.f32 %v185_v40, %v177_v31 }
 0x12f   : > { %v197_v43 = vpop.permute.xlu1 %196  ;;  %v203_v44 = vpop.permute.xlu0 %202 }
 0x130   : > { %v208_v46 = vadd.f32 %v203_v44, %v200_v45  ;;  %v201_v53 = vadd.f32 %v197_v43, %v189_v48 }
 0x133   : > { %v205_v49 = vpop.permute.xlu1 %204  ;;  %v213_v50 = vpop.permute.xlu0 %212 }
 0x134   : > { %v218_v51 = vadd.f32 %v213_v50, %v208_v46  ;;  %v209_v56 = vadd.f32 %v205_v49, %v201_v53 }
 0x136   : > { %v221_v60 = vmul.f32 0.20756121, %v218_v51  ;;  %v231_v0 = vmul.f32 0.5642099, %v218_v51  ;;  %v220_v10 = vmul.f32 0.010333864, %v218_v51 }
 0x137   : > { %v215_v57 = vpop.permute.xlu1 %214  ;;  %v310_v58 = vpop.permute.xlu0 %309 }
 0x138   : > { %v219_v61 = vadd.f32 %v215_v57, %v209_v56  ;;  %v315_v62 = vadd.f32 %v310_v58, %v305_v55  ;;  %v226_v4 = vrot.slane %v221_v60, 1  ;;  %v236_v11 = vrot.slane %v231_v0, 2 }
 0x139   : > { %v242_v18 = vrot.slane %v221_v60, 3  ;;  %v251_v26 = vrot.slane %v220_v10, 4 }
 0x13a   : > { %v222_v1 = vmul.f32 0.20756121, %v219_v61  ;;  %v232_v2 = vmul.f32 0.5642099, %v219_v61  ;;  %v247_v8 = vmul.f32 0.010333864, %v219_v61 }
 0x13b   : > { %v312_v3 = vpop.permute.xlu1 %311  ;;  %v318_v9 = vmul.f32 0.20756121, %v315_v62  ;;  %v327_v15 = vmul.f32 0.5642099, %v315_v62  ;;  %v317_v28 = vmul.f32 0.010333864, %v315_v62 }
 0x13c   : > { %v316_v5 = vadd.f32 %v312_v3, %v306_v63  ;;  %v227_v6 = vrot.slane %v222_v1, 1  ;;  %v237_v7 = vrot.slane %v232_v2, 2  ;;  %v243_v13 = vrot.slane %v222_v1, 3 }
 0x13d   : > { %v252_v20 = vrot.slane %v247_v8, 4  ;;  %v322_v21 = vrot.slane %v318_v9, 1  ;;  %v331_v30 = vrot.slane %v327_v15, 2  ;;  %v336_v36 = vrot.slane %v318_v9, 3 }
 0x13e   : > { %v228_v12 = vsel %vm225_vm3, %v226_v4, %v227_v6  ;;  %v319_v16 = vmul.f32 0.20756121, %v316_v5  ;;  %v328_v17 = vmul.f32 0.5642099, %v316_v5  ;;  %v238_v19 = vsel %vm235_vm4, %v236_v11, %v237_v7 }
 0x13f   : > { %v230_v14 = vadd.f32 %v228_v12, %v220_v10  ;;  %v341_v25 = vmul.f32 0.010333864, %v316_v5  ;;  %v244_v27 = vsel %vm241_vm5, %v242_v18, %v243_v13  ;;  %v253_v33 = vsel %vm250_vm6, %v251_v26, %v252_v20 }
 0x140   : > { %v323_v23 = vrot.slane %v319_v16, 1  ;;  %v332_v24 = vrot.slane %v328_v17, 2  ;;  %v337_v32 = vrot.slane %v319_v16, 3  ;;  %v344_v40 = vrot.slane %v317_v28, 4 }
 0x141   : > { %v240_v22 = vadd.f32 %v238_v19, %v230_v14  ;;  %v345_v38 = vrot.slane %v341_v25, 4 }
 0x142   : > { %v324_v31 = vsel %vm225_vm3, %v322_v21, %v323_v23  ;;  %v333_v37 = vsel %vm235_vm4, %v331_v30, %v332_v24  ;;  %v338_v41 = vsel %vm241_vm5, %v336_v36, %v337_v32 }
 0x143   : > { %v246_v29 = vadd.f32 %v244_v27, %v240_v22  ;;  %v326_v34 = vadd.f32 %v324_v31, %v317_v28  ;;  %v346_v43 = vsel %vm250_vm6, %v344_v40, %v345_v38 }
 0x145   : > { %v255_v35 = vadd.f32 %v253_v33, %v246_v29  ;;  %v335_v39 = vadd.f32 %v333_v37, %v326_v34 }
 0x147   : > { %257 = vst.msk [vmem:[%s152_s10] sm:$0xff] %vm256_vm7, %v255_v35  ;;  %v340_v42 = vadd.f32 %v338_v41, %v335_v39 }
 0x149   : > { %v348_v44 = vadd.f32 %v346_v43, %v340_v42 }
 0x14b   : > { %349 = vst.msk [vmem:[%s152_s10 + $0x8] sm:$0xff] %vm256_vm7, %v348_v44 }
 0x14c   : > { %601 = shalt.err (!%p598_p6)
}
 0x14d   : > { %s602_s14 = scalar_lea.hbm %s839_s26, 256  ;;  %s606_s18 = scalar_lea.hbm %s896_s1, 2048 }
 0x14e   : > { %p603_p7 = scmp.ne.s32.totalorder %s839_s26, %s602_s14  ;;  %p607_p13 = scmp.lt.s32.totalorder %s839_s26, %s896_s1 }
 0x14f   : > { %p608_p1 = scmp.lt.s32.totalorder %s606_s18, %s602_s14 }
 0x150   : > { %p604_p10 = pnand %p603_p7, %p772_p9 }
 0x151   : > { %p609_p8 = por %p608_p1, %p607_p13 }
 0x152   : > { %p605_p11 = pneg %p604_p10 }
 0x154   : > { %p610_p0 = pnand %p609_p8, %p605_p11 }
 0x156   : > { %613 = shalt.err (!%p610_p0)
}
 0x157   : > { %s695_s9 = smov 128   ;;  %s696_s10 = smov 8  }
 0x158   : > { %475 = dma.vmem_to_hbm [thread:$0]  (%p772_p9), %s841_s29, 256, %s839_s26, %s351_s4, %s695_s9, %s695_s9, %s696_s10  }
 0x159 PF: > { %p486_p2 = scmp.ge.s32.totalorder %s684_s13, 2  ;;  %s381_s20 = sand.u32 1, %s656_s6  }
 0x15a   : > { %s382_s30 = scalar_lea.sflag [#allocation4], %s381_s20 }
 0x15b   : > { %p482_p4 = pnand %p486_p2, %p778_p12 }
 0x15d   : > { %p483_p5 = pneg %p482_p4 }
 0x15f   : > { %651 = dma.done.wait (%p483_p5), %s382_s30, 256  }
 0x160   : > { %653 = vsyncadd (%p483_p5), %s382_s30, 4294967040  ;;  %s17_s13 = sadd.s32 1, %s684_s13   ;;  %s902_s6 = smov %s660_s7 }
 0x161   : > { %p14_p3 = scmp.ge.s32.totalorder %s17_s13, 10   ;;  %s903_s7 = smov %s664_s8 }
 0x162   : > { %s904_s8 = smov %s785_s27  ;;  %s905_s9 = smov %s676_s11 }
 0x163   : > { %s906_s10 = smov %s680_s12  ;;  %s907_s11 = smov %s910_s16 }
 0x164   : > { %s908_s12 = smov %s914_s17  ;;  %16 = sbr.rel (!%p14_p3) target bundleno = 7 (0x7), region = 69 }
 0x169   :  { %387 = vsyncpa [#allocation3], 1 }
 0x16a   :  { %389 = vsyncpa [#allocation3 + $0x1], 1 }
 0x16b   :  { %390 = vsyncpa [#allocation4], 1 }
 0x16c   :  { %392 = vsyncpa [#allocation4 + $0x1], 1 }

</bundles_post_ra>
